<compile_context>
chip_gen: v7x
topology: tpu7x:2x2x1
jax: 0.10.0
libtpu: 0.0.40
codegen_flags: <defaults>
</compile_context>

<pallas_src>
import functools
import math

import jax
import jax.numpy as jnp
from jax.experimental import pallas as pl
from jax.experimental.pallas import tpu as pltpu


def _round_up(x, m):
    return ((x + m - 1) // m) * m


def _critic_kernel(pi_ref, act_ref, w1p_ref, w1a_ref, w23_ref, bw_ref, bo_ref,
                   out_ref, *, inv_max, gamma, q_offset):
    """Fused fetch-critic MLP for one batch tile (MXU bf16, f32 accumulate)."""
    pi = pi_ref[...].astype(jnp.bfloat16)
    act = act_ref[...]
    if inv_max != 1.0:                       # static Python const; folds away when 1.0
        act = act * jnp.float32(inv_max)
    act = act.astype(jnp.bfloat16)

    # Layer 1: concat fused as two partial matmuls on the split W1.
    h = (jnp.dot(pi, w1p_ref[...], preferred_element_type=jnp.float32)
         + jnp.dot(act, w1a_ref[...], preferred_element_type=jnp.float32)
         + bw_ref[0:1, :])
    h = jnp.maximum(h, 0.0)

    # Layers 2 & 3: stacked weights, bf16 MXU operands, f32 bias/ReLU tail.
    h = jnp.dot(h.astype(jnp.bfloat16), w23_ref[0],
                preferred_element_type=jnp.float32) + bw_ref[1:2, :]
    h = jnp.maximum(h, 0.0)
    h = jnp.dot(h.astype(jnp.bfloat16), w23_ref[1],
                preferred_element_type=jnp.float32) + bw_ref[2:3, :]
    h = jnp.maximum(h, 0.0)

    # Head (H -> 1): VPU multiply + lane reduce instead of a 1-wide MXU matmul.
    q = jnp.sum(h * bw_ref[3:4, :], axis=-1, keepdims=True) + bo_ref[0, 0]

    if gamma is not None:
        # get_dist tail: log(1 + q*(1-gamma)) / log(gamma) [+ 1]  -> free EUP slot.
        q = jnp.log(1.0 + q * jnp.float32(1.0 - gamma)) * jnp.float32(1.0 / math.log(gamma))
        if q_offset:
            q = q + 1.0

    # TODO(synk): for very large B, present a lane-dense output (e.g. (B//128,128))
    # instead of the 1-wide masked store; negligible at small B.
    out_ref[...] = q.astype(out_ref.dtype)


def _critic_pallas(pi_inputs, actions, params, max_action, gamma=None, q_offset=False):
    B, obs_dim = pi_inputs.shape
    act_dim = actions.shape[-1]
    H = params["w23"].shape[-1]
    inv_max = 1.0 / float(max_action)

    # Batch-tiled 1-D grid. Weights have a constant block index -> VMEM-resident,
    # activation/output tiles stream (double-buffered). Footprint is tiny vs VMEM
    # on v5e/v6e (128 MiB) and v7x (64 MiB).
    TB = 256 if B >= 256 else _round_up(B, 8)
    B_pad = _round_up(B, TB)
    if B_pad != B:
        pad = B_pad - B
        pi_inputs = jnp.pad(pi_inputs, ((0, pad), (0, 0)))
        actions = jnp.pad(actions, ((0, pad), (0, 0)))
    n_tiles = B_pad // TB

    kernel = functools.partial(_critic_kernel, inv_max=inv_max, gamma=gamma,
                               q_offset=q_offset)

    grid_spec = pltpu.PrefetchScalarGridSpec(
        num_scalar_prefetch=0,
        grid=(n_tiles,),
        in_specs=[
            pl.BlockSpec((TB, obs_dim), lambda i: (i, 0)),       # pi_inputs tile
            pl.BlockSpec((TB, act_dim), lambda i: (i, 0)),       # actions tile
            pl.BlockSpec((obs_dim, H), lambda i: (0, 0)),        # W1_pi  (resident)
            pl.BlockSpec((act_dim, H), lambda i: (0, 0)),        # W1_act (resident)
            pl.BlockSpec((2, H, H), lambda i: (0, 0, 0)),        # stacked W2 / W3
            pl.BlockSpec((4, H), lambda i: (0, 0)),              # b1,b2,b3,wo_row
            pl.BlockSpec(memory_space=pltpu.MemorySpace.SMEM),   # bo scalar
        ],
        out_specs=pl.BlockSpec((TB, 1), lambda i: (i, 0)),
    )

    q = pl.pallas_call(
        kernel,
        out_shape=jax.ShapeDtypeStruct((B_pad, 1), jnp.float32),
        grid_spec=grid_spec,
        compiler_params=pltpu.CompilerParams(
            dimension_semantics=("parallel",),   # megacore / v7x 2-TC sharding of batch
        ),
    )(pi_inputs.astype(jnp.float32), actions.astype(jnp.float32),
      params["w1_pi"], params["w1_act"], params["w23"], params["bw"], params["bo"])

    return q[:B] if B_pad != B else q


def dist_reverse_critic_forward(pi_inputs, actions, params, max_action=1.0):
    """forward(): q_value of shape (B, 1)."""
    return _critic_pallas(pi_inputs, actions, params, max_action)


def dist_reverse_critic_get_dist(pi_inputs, actions, params, max_action=1.0,
                                 gamma=0.98, q_offset=False):
    """get_dist(): log(1 + q*(1-gamma))/log(gamma) [+1], fused into the same kernel."""
    return _critic_pallas(pi_inputs, actions, params, max_action,
                          gamma=gamma, q_offset=q_offset)


def init_params(key, obs_goal_dim, act_dim, hidden):
    """Synthetic params pre-packed into the kernel layout (done once, off hot path):
       W1 split pi/act, W2/W3 stacked, all MXU weights bf16; b1/b2/b3/wo_row stacked f32;
       bo as a (1,1) SMEM scalar."""
    ks = jax.random.split(key, 4)

    def lin(k, fan_in, fan_out):
        scale = 1.0 / jnp.sqrt(jnp.float32(fan_in))
        kw, kb = jax.random.split(k)
        w = jax.random.uniform(kw, (fan_in, fan_out), jnp.float32, -scale, scale)
        b = jax.random.uniform(kb, (fan_out,), jnp.float32, -scale, scale)
        return w, b

    in_dim = obs_goal_dim + act_dim
    w1, b1 = lin(ks[0], in_dim, hidden)
    w2, b2 = lin(ks[1], hidden, hidden)
    w3, b3 = lin(ks[2], hidden, hidden)
    wo, bo = lin(ks[3], hidden, 1)

    return dict(
        w1_pi=w1[:obs_goal_dim].astype(jnp.bfloat16),
        w1_act=w1[obs_goal_dim:].astype(jnp.bfloat16),
        w23=jnp.stack([w2, w3]).astype(jnp.bfloat16),
        bw=jnp.stack([b1, b2, b3, wo[:, 0]]),          # (4, H) f32
        bo=bo.reshape(1, 1),                           # (1, 1) f32 -> SMEM
    )


if __name__ == "__main__":
    # Small shapes: batch=8, obs+goal=16, action=4, hidden=128 (lane-aligned).
    B, OBS_GOAL, ACT, HIDDEN = 8, 16, 4, 128
    MAX_ACTION = 1.0
    GAMMA = 0.98

    key = jax.random.PRNGKey(0)
    k_in, k_act, k_par = jax.random.split(key, 3)
    pi_inputs = jax.random.normal(k_in, (B, OBS_GOAL), jnp.float32)
    actions = jax.random.uniform(k_act, (B, ACT), jnp.float32, -1.0, 1.0)
    params = init_params(k_par, OBS_GOAL, ACT, HIDDEN)

    q_value = dist_reverse_critic_forward(pi_inputs, actions, params, MAX_ACTION)
    jax.block_until_ready(q_value)
    assert q_value.shape == (B, 1)

    dist = dist_reverse_critic_get_dist(pi_inputs, actions, params, MAX_ACTION,
                                        gamma=GAMMA, q_offset=True)
    jax.block_until_ready(dist)
    assert dist.shape == (B, 1)

    # Pure-JAX reference with matching bf16-operand / f32-accumulate numerics.
    pi_b = pi_inputs.astype(jnp.bfloat16)
    act_b = (actions * (1.0 / MAX_ACTION)).astype(jnp.bfloat16)
    h = (jnp.dot(pi_b, params["w1_pi"], preferred_element_type=jnp.float32)
         + jnp.dot(act_b, params["w1_act"], preferred_element_type=jnp.float32)
         + params["bw"][0])
    h = jnp.maximum(h, 0.0)
    h = jnp.maximum(jnp.dot(h.astype(jnp.bfloat16), params["w23"][0],
                            preferred_element_type=jnp.float32) + params["bw"][1], 0.0)
    h = jnp.maximum(jnp.dot(h.astype(jnp.bfloat16), params["w23"][1],
                            preferred_element_type=jnp.float32) + params["bw"][2], 0.0)
    q_ref = jnp.sum(h * params["bw"][3], axis=-1, keepdims=True) + params["bo"][0, 0]
    dist_ref = jnp.log(1.0 + q_ref * (1.0 - GAMMA)) / math.log(GAMMA) + 1.0

    assert jnp.allclose(q_value, q_ref, atol=2e-3, rtol=2e-3), \
        float(jnp.max(jnp.abs(q_value - q_ref)))
    assert jnp.allclose(dist, dist_ref, atol=2e-3, rtol=2e-3), \
        float(jnp.max(jnp.abs(dist - dist_ref)))

    print("KERNEL_OK")
</pallas_src>

<mosaic_0001>
module attributes {stable_mosaic.version = 11 : i64} {
  func.func @_critic_kernel(%arg0: i32, %arg1: memref<8x16xf32, #tpu.memory_space<vmem>>, %arg2: memref<8x4xf32, #tpu.memory_space<vmem>>, %arg3: memref<16x128xbf16, #tpu.memory_space<vmem>>, %arg4: memref<4x128xbf16, #tpu.memory_space<vmem>>, %arg5: memref<2x128x128xbf16, #tpu.memory_space<vmem>>, %arg6: memref<4x128xf32, #tpu.memory_space<vmem>>, %arg7: memref<1x1xf32, #tpu.memory_space<smem>>, %arg8: memref<8x1xf32, #tpu.memory_space<vmem>>) attributes {dimension_semantics = [#tpu.dimension_semantics<parallel>], iteration_bounds = array<i64: 1>, scalar_prefetch = 0 : i64, scratch_operands = 0 : i64, tpu.core_type = #tpu.core_type<tc>, window_params = [{transform_indices = @transform_0, window_bounds = array<i64: 8, 16>}, {transform_indices = @transform_1, window_bounds = array<i64: 8, 4>}, {pipeline_mode = #tpu.pipeline_mode<synchronous>, transform_indices = @transform_2, window_bounds = array<i64: 16, 128>}, {pipeline_mode = #tpu.pipeline_mode<synchronous>, transform_indices = @transform_3, window_bounds = array<i64: 4, 128>}, {pipeline_mode = #tpu.pipeline_mode<synchronous>, transform_indices = @transform_4, window_bounds = array<i64: 2, 128, 128>}, {pipeline_mode = #tpu.pipeline_mode<synchronous>, transform_indices = @transform_5, window_bounds = array<i64: 4, 128>}, {transform_indices = @transform_6, window_bounds = array<i64: 1, 1>}, {transform_indices = @transform_7, window_bounds = array<i64: 8, 1>}]} {
    %c0 = arith.constant 0 : index
    %c0_0 = arith.constant 0 : index
    %0 = vector.load %arg1[%c0, %c0_0] : memref<8x16xf32, #tpu.memory_space<vmem>>, vector<8x16xf32>
    %1 = arith.truncf %0 : vector<8x16xf32> to vector<8x16xbf16>
    %c0_1 = arith.constant 0 : index
    %c0_2 = arith.constant 0 : index
    %2 = vector.load %arg2[%c0_1, %c0_2] : memref<8x4xf32, #tpu.memory_space<vmem>>, vector<8x4xf32>
    %3 = arith.truncf %2 : vector<8x4xf32> to vector<8x4xbf16>
    %c0_3 = arith.constant 0 : index
    %c0_4 = arith.constant 0 : index
    %4 = vector.load %arg3[%c0_3, %c0_4] : memref<16x128xbf16, #tpu.memory_space<vmem>>, vector<16x128xbf16>
    %cst = arith.constant dense<0.000000e+00> : vector<8x128xf32>
    %5 = tpu.matmul %1, %4, %cst {dimension_numbers = #tpu.dot_dimension_numbers<[1], [0], [0], [1], [0, 0, 1, 1], [], []>} : vector<8x16xbf16>, vector<16x128xbf16>, vector<8x128xf32> -> vector<8x128xf32>
    %c0_5 = arith.constant 0 : index
    %c0_6 = arith.constant 0 : index
    %6 = vector.load %arg4[%c0_5, %c0_6] : memref<4x128xbf16, #tpu.memory_space<vmem>>, vector<4x128xbf16>
    %cst_7 = arith.constant dense<0.000000e+00> : vector<8x128xf32>
    %7 = tpu.matmul %3, %6, %cst_7 {dimension_numbers = #tpu.dot_dimension_numbers<[1], [0], [0], [1], [0, 0, 1, 1], [], []>} : vector<8x4xbf16>, vector<4x128xbf16>, vector<8x128xf32> -> vector<8x128xf32>
    %8 = arith.addf %5, %7 : vector<8x128xf32>
    %c0_8 = arith.constant 0 : index
    %c0_9 = arith.constant 0 : index
    %9 = vector.load %arg6[%c0_8, %c0_9] : memref<4x128xf32, #tpu.memory_space<vmem>>, vector<1x128xf32>
    %10 = vector.broadcast %9 : vector<1x128xf32> to vector<8x128xf32>
    %11 = arith.addf %8, %10 : vector<8x128xf32>
    %cst_10 = arith.constant 0.000000e+00 : f32
    %12 = vector.broadcast %cst_10 : f32 to vector<8x128xf32>
    %13 = arith.maximumf %11, %12 : vector<8x128xf32>
    %14 = arith.truncf %13 : vector<8x128xf32> to vector<8x128xbf16>
    %c0_11 = arith.constant 0 : index
    %c0_12 = arith.constant 0 : index
    %c0_13 = arith.constant 0 : index
    %15 = vector.load %arg5[%c0_11, %c0_12, %c0_13] : memref<2x128x128xbf16, #tpu.memory_space<vmem>>, vector<1x128x128xbf16>
    %16 = vector.shape_cast %15 : vector<1x128x128xbf16> to vector<128x128xbf16>
    %cst_14 = arith.constant dense<0.000000e+00> : vector<8x128xf32>
    %17 = tpu.matmul %14, %16, %cst_14 {dimension_numbers = #tpu.dot_dimension_numbers<[1], [0], [0], [1], [0, 0, 1, 1], [], []>} : vector<8x128xbf16>, vector<128x128xbf16>, vector<8x128xf32> -> vector<8x128xf32>
    %c1 = arith.constant 1 : index
    %c0_15 = arith.constant 0 : index
    %18 = vector.load %arg6[%c1, %c0_15] : memref<4x128xf32, #tpu.memory_space<vmem>>, vector<1x128xf32>
    %19 = vector.broadcast %18 : vector<1x128xf32> to vector<8x128xf32>
    %20 = arith.addf %17, %19 : vector<8x128xf32>
    %cst_16 = arith.constant 0.000000e+00 : f32
    %21 = vector.broadcast %cst_16 : f32 to vector<8x128xf32>
    %22 = arith.maximumf %20, %21 : vector<8x128xf32>
    %23 = arith.truncf %22 : vector<8x128xf32> to vector<8x128xbf16>
    %c1_17 = arith.constant 1 : index
    %c0_18 = arith.constant 0 : index
    %c0_19 = arith.constant 0 : index
    %24 = vector.load %arg5[%c1_17, %c0_18, %c0_19] : memref<2x128x128xbf16, #tpu.memory_space<vmem>>, vector<1x128x128xbf16>
    %25 = vector.shape_cast %24 : vector<1x128x128xbf16> to vector<128x128xbf16>
    %cst_20 = arith.constant dense<0.000000e+00> : vector<8x128xf32>
    %26 = tpu.matmul %23, %25, %cst_20 {dimension_numbers = #tpu.dot_dimension_numbers<[1], [0], [0], [1], [0, 0, 1, 1], [], []>} : vector<8x128xbf16>, vector<128x128xbf16>, vector<8x128xf32> -> vector<8x128xf32>
    %c2 = arith.constant 2 : index
    %c0_21 = arith.constant 0 : index
    %27 = vector.load %arg6[%c2, %c0_21] : memref<4x128xf32, #tpu.memory_space<vmem>>, vector<1x128xf32>
    %28 = vector.broadcast %27 : vector<1x128xf32> to vector<8x128xf32>
    %29 = arith.addf %26, %28 : vector<8x128xf32>
    %cst_22 = arith.constant 0.000000e+00 : f32
    %30 = vector.broadcast %cst_22 : f32 to vector<8x128xf32>
    %31 = arith.maximumf %29, %30 : vector<8x128xf32>
    %c3 = arith.constant 3 : index
    %c0_23 = arith.constant 0 : index
    %32 = vector.load %arg6[%c3, %c0_23] : memref<4x128xf32, #tpu.memory_space<vmem>>, vector<1x128xf32>
    %33 = vector.broadcast %32 : vector<1x128xf32> to vector<8x128xf32>
    %34 = arith.mulf %31, %33 : vector<8x128xf32>
    %cst_24 = arith.constant dense<0.000000e+00> : vector<8xf32>
    %35 = vector.multi_reduction <add>, %34, %cst_24 [1] : vector<8x128xf32> to vector<8xf32>
    %36 = vector.shape_cast %35 : vector<8xf32> to vector<8x1xf32>
    %c0_25 = arith.constant 0 : index
    %c0_26 = arith.constant 0 : index
    %37 = memref.load %arg7[%c0_25, %c0_26] : memref<1x1xf32, #tpu.memory_space<smem>>
    %38 = vector.broadcast %37 : f32 to vector<8x1xf32>
    %39 = arith.addf %36, %38 : vector<8x1xf32>
    %c0_27 = arith.constant 0 : index
    %c0_28 = arith.constant 0 : index
    %40 = vector.load %arg8[%c0_27, %c0_28] : memref<8x1xf32, #tpu.memory_space<vmem>>, vector<8x1xf32>
    tpu.vector_store %arg8[%c0_27, %c0_28], %39 {strides = array<i32>} : memref<8x1xf32, #tpu.memory_space<vmem>>, vector<8x1xf32>,
    return
  }
  func.func @transform_0(%arg0: i32) -> (i32, i32) {
    %c0_i32 = arith.constant 0 : i32
    %c0_i32_0 = arith.constant 0 : i32
    return %arg0, %c0_i32 : i32, i32
  }
  func.func @transform_1(%arg0: i32) -> (i32, i32) {
    %c0_i32 = arith.constant 0 : i32
    %c0_i32_0 = arith.constant 0 : i32
    return %arg0, %c0_i32 : i32, i32
  }
  func.func @transform_2(%arg0: i32) -> (i32, i32) {
    %c0_i32 = arith.constant 0 : i32
    %c0_i32_0 = arith.constant 0 : i32
    %c0_i32_1 = arith.constant 0 : i32
    return %c0_i32, %c0_i32_0 : i32, i32
  }
  func.func @transform_3(%arg0: i32) -> (i32, i32) {
    %c0_i32 = arith.constant 0 : i32
    %c0_i32_0 = arith.constant 0 : i32
    %c0_i32_1 = arith.constant 0 : i32
    return %c0_i32, %c0_i32_0 : i32, i32
  }
  func.func @transform_4(%arg0: i32) -> (i32, i32, i32) {
    %c0_i32 = arith.constant 0 : i32
    %c0_i32_0 = arith.constant 0 : i32
    %c0_i32_1 = arith.constant 0 : i32
    %c0_i32_2 = arith.constant 0 : i32
    return %c0_i32, %c0_i32_0, %c0_i32_1 : i32, i32, i32
  }
  func.func @transform_5(%arg0: i32) -> (i32, i32) {
    %c0_i32 = arith.constant 0 : i32
    %c0_i32_0 = arith.constant 0 : i32
    %c0_i32_1 = arith.constant 0 : i32
    return %c0_i32, %c0_i32_0 : i32, i32
  }
  func.func @transform_6(%arg0: i32) -> (i32, i32) {
    %c0_i32 = arith.constant 0 : i32
    %c0_i32_0 = arith.constant 0 : i32
    %c0_i32_1 = arith.constant 0 : i32
    return %c0_i32, %c0_i32_0 : i32, i32
  }
  func.func @transform_7(%arg0: i32) -> (i32, i32) {
    %c0_i32 = arith.constant 0 : i32
    %c0_i32_0 = arith.constant 0 : i32
    return %arg0, %c0_i32 : i32, i32
  }
}

</mosaic_0001>

<bundles_post_ra>
// kernel: tpu_custom_call.1
= control target key start
LH: loop header
LB: loop body
LE: loop exit
PB: predicated region body
PF: predicated region fallthrough
CT: control target
= control target key end

     0   :  { %13 = vsyncpa [#allocation4], 0  ;;  %s538_s24 = smov [#allocation3]   ;;  %s651_s0 = inlined_call_operand.vmem [shape: f32[8,16], index: 0, kind: input, shape index: {}]   ;;  %s652_s1 = inlined_call_operand.vmem [shape: f32[8,4], index: 1, kind: input, shape index: {}]   ;;  %s653_s2 = inlined_call_operand.vmem [shape: bf16[16,128], index: 2, kind: input, shape index: {}]   ;;  %s654_s3 = inlined_call_operand.vmem [shape: bf16[4,128], index: 3, kind: input, shape index: {}]   ;;  %s655_s4 = inlined_call_operand.hbm [shape: bf16[2,128,128], index: 4, kind: input, shape index: {}]   ;;  %s656_s5 = inlined_call_operand.vmem [shape: f32[4,128], index: 5, kind: input, shape index: {}]   ;;  %s657_s6 = inlined_call_operand.<no memory space> [shape: f32[1,1], index: 6, kind: input, shape index: {}]   ;;  %s658_s7 = inlined_call_operand.vmem [shape: f32[8,1], index: 7, kind: output, shape index: {}]  }
   0x1   :  { %s27_s25 = sshll.u32 %s538_s24, 4  ;;  %s514_s28 = scalar_lea.hbm %s655_s4, 2048  ;;  %s28_s25 = int_to_ptr.vmem [resolvable:$true] %s27_s25 }
   0x2   :  { %p515_p0 = scmp.ne.s32.totalorder %s655_s4, %s514_s28  ;;  %p518_p1 = scmp.lt.u32.totalorder %s514_s28, %s655_s4 }
   0x4   :  { %p520_p2 = pnand %p518_p1, %p515_p0 }
   0x6   :  { %523 = shalt.err (!%p520_p2)
}
   0x7   :  { %s524_s10 = scalar_lea.vmem %s28_s25, 2048  ;;  %p529_p4 = scmp.lt.s32.totalorder %s28_s25, %s28_s25 }
   0x8   :  { %p525_p3 = scmp.ne.s32.totalorder %s28_s25, %s524_s10  ;;  %p530_p5 = scmp.lt.s32.totalorder %s524_s10, %s524_s10 }
   0xa   :  { %p531_p6 = por %p530_p5, %p529_p4 }
   0xc   :  { %p532_p7 = pnand %p531_p6, %p525_p3 }
   0xe   :  { %535 = shalt.err (!%p532_p7)
}
   0xf   :  { %s539_s11 = smov 64   ;;  %s540_s12 = smov 4  }
  0x10   :  { %33 = dma.hbm_to_vmem [thread:$0]  %s655_s4, 2048, %s28_s25, [#allocation4], %s539_s11, %s539_s11, %s540_s12  }
  0x11   :  { %536 = dma.done.wait [#allocation4], 2048  }
  0x12   :  { %537 = vsyncadd [#allocation4], 4294965248  ;;  %v541_v0 = vmov 0.0   ;;  %vm542_vm0 = vmmov 0   ;;  %vm53_vm1 = vcmask 1041408   ;;  %v497_v3 = vld [vmem:[%s653_s2] sm:$0xff]   ;;  %v386_v54 = vstv %s657_s6 }
  0x13   :  { %440 = vmatprep.subr.bf16.mxu0 %v541_v0  ;;  %446 = vmatprep.subr.bf16.mxu1 %v541_v0  ;;  %v48_v1 = vld [vmem:[%s654_s3] sm:$0x3]  ;;  %vm49_vm2 = vcmask 31744   ;;  %vm103_vm3 = vcmask 130048   ;;  %v499_v9 = vld [vmem:[#allocation3 + $0x8] sm:$0xff]   ;;  %v500_v10 = vld [vmem:[#allocation3 + $0x10] sm:$0xff]  }
  0x14   :  { %442 = vmatprep.mubr.msk.bf16.mxu0 %vm542_vm0, %v541_v0  ;;  %448 = vmatprep.mubr.msk.bf16.mxu1 %vm542_vm0, %v541_v0  ;;  %v55_v2 = vsel %vm53_vm1, %v48_v1, 0  ;;  %v44_v4 = vld [vmem:[%s652_s1] sm:$0xff]  ;;  %v501_v11 = vld [vmem:[#allocation3 + $0x18] sm:$0xff]   ;;  %v503_v13 = vld [vmem:[#allocation3 + $0x28] sm:$0xff]   ;;  %vm388_vm4 = vcmask 7168  }
  0x15   :  { %v42_v5 = vld [vmem:[%s651_s0] sm:$0xff]  ;;  %441 = vmatpush3.bf16.msra.mxu0 %v55_v2  ;;  %v45_v6 = vpack.c.bf16 %v44_v4, %v44_v4  ;;  %447 = vmatpush3.bf16.msra.mxu1 %v497_v3  ;;  %v504_v14 = vld [vmem:[#allocation3 + $0x30] sm:$0xff]   ;;  %v505_v15 = vld [vmem:[#allocation3 + $0x38] sm:$0xff]  }
  0x16   :  { %v43_v7 = vpack.c.bf16 %v42_v5, %v42_v5  ;;  %v498_v8 = vld [vmem:[#allocation3] sm:$0xff]   ;;  %452 = vmatprep.subr.bf16.mxu0 %v541_v0  ;;  %472 = vmatprep.subr.bf16.mxu1 %v541_v0  ;;  %v507_v17 = vld [vmem:[#allocation3 + $0x48] sm:$0xff]   ;;  %v508_v18 = vld [vmem:[#allocation3 + $0x50] sm:$0xff]  }
  0x17   :  { %v502_v12 = vld [vmem:[#allocation3 + $0x20] sm:$0xff]   ;;  %v509_v19 = vld [vmem:[#allocation3 + $0x58] sm:$0xff]   ;;  %v511_v21 = vld [vmem:[#allocation3 + $0x68] sm:$0xff]  }
  0x18   :  { %443 = vmatmul.mubr.msk.bf16.vlgmr.msra.gmra.mrb[0].mxu0 %vm49_vm2, %v45_v6  ;;  %449 = vmatmul.mubr.msk.bf16.vlgmr.msra.gmra.mrb[0].mxu1 %vm103_vm3, %v43_v7  ;;  %v506_v16 = vld [vmem:[#allocation3 + $0x40] sm:$0xff]   ;;  %v512_v35 = vld [vmem:[#allocation3 + $0x70] sm:$0xff]   ;;  %v513_v36 = vld [vmem:[#allocation3 + $0x78] sm:$0xff]  }
  0x19   :  { %453 = vmatpush3.bf16.msra.mxu0 %v498_v8  ;;  %468 = vmatprep.mubr.msk.bf16.mxu0 %vm542_vm0, %v541_v0  ;;  %v510_v20 = vld [vmem:[#allocation3 + $0x60] sm:$0xff]  }
  0x1a   :  { %454 = vmatprep.subr.bf16.mxu0 %v541_v0  ;;  %488 = vmatprep.mubr.msk.bf16.mxu1 %vm542_vm0, %v541_v0  ;;  %v398_v25 = vld [vmem:[%s656_s5] ss:$0 sm:$0xff]  ;;  %v399_v37 = vld [vmem:[%s656_s5 + $0x1] ss:$0 sm:$0xff]  ;;  %v408_v45 = vld [vmem:[%s656_s5 + $0x2] ss:$0 sm:$0xff] }
  0x1b   :  { %473 = vmatpush3.bf16.msra.mxu1 %v506_v16  ;;  %v417_v50 = vld [vmem:[%s656_s5 + $0x3] ss:$0 sm:$0xff] }
  0x1c   :  { %474 = vmatprep.subr.bf16.mxu1 %v541_v0 }
  0x1d   :  { %455 = vmatpush3.bf16.msra.mxu0 %v499_v9 }
  0x1e   :  { %456 = vmatprep.subr.bf16.mxu0 %v541_v0 }
  0x1f   :  { %475 = vmatpush3.bf16.msra.mxu1 %v507_v17 }
  0x20   :  { %476 = vmatprep.subr.bf16.mxu1 %v541_v0 }
  0x21   :  { %457 = vmatpush3.bf16.msra.mxu0 %v500_v10 }
  0x22   :  { %458 = vmatprep.subr.bf16.mxu0 %v541_v0 }
  0x23   :  { %477 = vmatpush3.bf16.msra.mxu1 %v508_v18 }
  0x24   :  { %478 = vmatprep.subr.bf16.mxu1 %v541_v0 }
  0x25   :  { %459 = vmatpush3.bf16.msra.mxu0 %v501_v11 }
  0x26   :  { %460 = vmatprep.subr.bf16.mxu0 %v541_v0 }
  0x27   :  { %479 = vmatpush3.bf16.msra.mxu1 %v509_v19 }
  0x28   :  { %480 = vmatprep.subr.bf16.mxu1 %v541_v0 }
  0x29   :  { %461 = vmatpush3.bf16.msra.mxu0 %v502_v12 }
  0x2a   :  { %462 = vmatprep.subr.bf16.mxu0 %v541_v0 }
  0x2b   :  { %481 = vmatpush3.bf16.msra.mxu1 %v510_v20 }
  0x2c   :  { %482 = vmatprep.subr.bf16.mxu1 %v541_v0 }
  0x2d   :  { %463 = vmatpush3.bf16.msra.mxu0 %v503_v13 }
  0x2e   :  { %464 = vmatprep.subr.bf16.mxu0 %v541_v0 }
  0x2f   :  { %483 = vmatpush3.bf16.msra.mxu1 %v511_v21 }
  0x30   :  { %484 = vmatprep.subr.bf16.mxu1 %v541_v0 }
  0x31   :  { %465 = vmatpush3.bf16.msra.mxu0 %v504_v14 }
  0x32   :  { %466 = vmatprep.subr.bf16.mxu0 %v541_v0 }
  0x33   :  { %485 = vmatpush3.bf16.msra.mxu1 %v512_v35 }
  0x34   :  { %486 = vmatprep.subr.bf16.mxu1 %v541_v0 }
  0x35   :  { %467 = vmatpush3.bf16.msra.mxu0 %v505_v15 }
  0x37   :  { %487 = vmatpush3.bf16.msra.mxu1 %v513_v36 }
  0xeb   :  { %v91_v22 = vpop.f32.mrb[0].mxu0  ;;  %v141_v24 = vpop.f32.mrb[0].mxu1 }
  0xec   :  { %v444_v23 = vpop.f32.mrb[1].mxu0  ;;  %v142_v26 = vadd.f32 %v141_v24, %v91_v22  ;;  %v450_v28 = vpop.f32.mrb[1].mxu1 }
  0xed   :  { %v94_v27 = vpop.f32.mrb[2].mxu0  ;;  %v144_v30 = vpop.f32.mrb[2].mxu1 }
  0xee   :  { %v445_v29 = vpop.f32.mrb[3].mxu0  ;;  %v152_v31 = vadd.f32 %v398_v25, %v142_v26  ;;  %v451_v32 = vpop.f32.mrb[3].mxu1 }
  0xf0   :  { %v153_v33 = vmax.f32 %v152_v31, 0.0 }
  0xf2   :  { %v154_v34 = vpack.c.bf16 %v153_v33, %v153_v33 }
  0xf4   :  { %469 = vmatmul.mubr.bf16.vlgmr.msra.gmra.mrb[4].mxu0 %v154_v34 }
 0x1c7   :  { %v258_v38 = vpop.f32.mrb[4].mxu0 }
 0x1c8   :  { %v259_v39 = vadd.f32 %v399_v37, %v258_v38  ;;  %v470_v40 = vpop.f32.mrb[5].mxu0 }
 0x1c9   :  { %v261_v41 = vpop.f32.mrb[6].mxu0 }
 0x1ca   :  { %v264_v42 = vmax.f32 %v259_v39, 0.0  ;;  %v471_v43 = vpop.f32.mrb[7].mxu0 }
 0x1cc   :  { %v265_v44 = vpack.c.bf16 %v264_v42, %v264_v42 }
 0x1ce   :  { %489 = vmatmul.mubr.bf16.vlgmr.msra.gmra.mrb[4].mxu1 %v265_v44 }
 0x2a1   :  { %v370_v46 = vpop.f32.mrb[4].mxu1 }
 0x2a2   :  { %v371_v47 = vadd.f32 %v408_v45, %v370_v46  ;;  %v490_v48 = vpop.f32.mrb[5].mxu1 }
 0x2a3   :  { %v373_v49 = vpop.f32.mrb[6].mxu1 }
 0x2a4   :  { %v376_v51 = vmax.f32 %v371_v47, 0.0  ;;  %v491_v52 = vpop.f32.mrb[7].mxu1 }
 0x2a6   :  { %v382_v53 = vmul.f32 %v417_v50, %v376_v51 }
 0x2a8   :  { %383 = vadd.xlane.f32.xlu0 %v382_v53 }
 0x335   :  { %v384_v55 = vpop.xlane.xlu0 %383 }
 0x336   :  { %v387_v56 = vadd.f32 %v386_v54, %v384_v55 }
 0x338   :  { %389 = vst.msk [vmem:[%s658_s7] sm:$0xff] %vm388_vm4, %v387_v56 }
 0x339   :  { %394 = vsyncpa [#allocation4], 1 }

</bundles_post_ra>
